<compile_context>
chip_gen: v7x
topology: tpu7x:2x2x1
jax: 0.10.0
libtpu: 0.0.40
codegen_flags: <defaults>
</compile_context>

<pallas_src>
import functools
import math

import jax
import jax.numpy as jnp
from jax.experimental import pallas as pl
from jax.experimental.pallas import tpu as pltpu

_LANE = 128
_SUBLANE = 8
_TARGET_TILE_BYTES = 4 << 20      # per-buffer tile budget (v6e/v7x roofline sweet spot)
_MEGACORE_SPLIT_BYTES = 2 << 20   # above this, force >=2 row tiles so both v7x TCs work
_VMEM_SLACK_BYTES = 2 << 20       # headroom for Mosaic internal scratch


def _add_pe_kernel(x_ref, pe_ref, o_ref):
    # x_ref/o_ref: (tr, tc) lane-dense tile; pe_ref: (1, tc) -> sublane-broadcast
    # add, pure VPU work. pe is already in x's dtype (pre-cast once, outside).
    o_ref[...] = x_ref[...] + pe_ref[...]


def make_positional_encoding(d_model: int, max_len: int = 60,
                             dtype=jnp.float32) -> jax.Array:
    """Build the (1, max_len, d_model) pe buffer, matching the PyTorch __init__."""
    position = jnp.arange(0, max_len, dtype=jnp.float32)[:, None]            # (L, 1)
    div_term = jnp.exp(
        jnp.arange(0, d_model, 2, dtype=jnp.float32)
        * (-math.log(10000.0) / d_model)
    )                                                                         # (ceil(D/2),)
    pe = jnp.zeros((max_len, d_model), dtype=jnp.float32)
    pe = pe.at[:, 0::2].set(jnp.sin(position * div_term))
    # Slice div_term for the cos branch so odd d_model works too.
    pe = pe.at[:, 1::2].set(jnp.cos(position * div_term[: d_model // 2]))
    return pe[None].astype(dtype)                                             # (1, L, D)


def _round_up(x: int, m: int) -> int:
    return (x + m - 1) // m * m


def _pick_tiles(B: int, F: int, itemsize: int):
    """Jointly pick (tr, tc, min_tr) so one buffer stays ~<= _TARGET_TILE_BYTES."""
    # Packed-sublane row granularity: 8 for f32, 16 for bf16, 32 for int8/fp8.
    min_tr = max(_SUBLANE, 32 // itemsize)
    F_pad = _round_up(F, _LANE)

    # Column tile: keep the whole lane-dense row (so the pe block is resident and
    # DMA'd once) unless even a minimal min_tr-row slab of it blows the budget.
    if min_tr * F_pad * itemsize <= _TARGET_TILE_BYTES or F <= _LANE:
        tc = F                                   # full extent: always legal
    else:
        tc = max(_LANE,
                 (_TARGET_TILE_BYTES // (min_tr * itemsize)) // _LANE * _LANE)
        tc = min(tc, F_pad)                      # 128-multiple; edge tile is masked
    tc_pad = F_pad if tc == F else tc

    # Row tile: fill the remaining per-buffer budget with packed-aligned rows.
    if B <= min_tr:
        tr = B                                   # full-extent rows are always legal
    else:
        tr = max(min_tr,
                 (_TARGET_TILE_BYTES // (tc_pad * itemsize)) // min_tr * min_tr)
        tr = min(tr, _round_up(B, min_tr))
        # v7x megacore: guarantee >= 2 row tiles when the job is worth splitting.
        if (pl.cdiv(B, tr) == 1 and B >= 2 * min_tr
                and B * F_pad * itemsize > _MEGACORE_SPLIT_BYTES):
            tr = _round_up(pl.cdiv(B, 2), min_tr)
    return tr, tc, min_tr


@jax.jit
def positional_encoding_forward(x: jax.Array, pe: jax.Array) -> jax.Array:
    """y = x + pe[:, :x.shape[1]]   (x: (B, S, D), pe: (1, max_len, D))."""
    B, S, D = x.shape
    assert S <= pe.shape[1], f"seq len {S} exceeds pe max_len {pe.shape[1]}"
    assert pe.shape[2] == D, f"d_model mismatch: x has {D}, pe has {pe.shape[2]}"

    F = S * D
    itemsize = jnp.dtype(x.dtype).itemsize
    # Lane-dense 2D views (metadata-only under jit; slice/cast/reshape fuse).
    x2 = x.reshape(B, F)
    pe2 = pe[:, :S, :].astype(x.dtype).reshape(1, F)

    tr, tc, min_tr = _pick_tiles(B, F, itemsize)
    n_row = pl.cdiv(B, tr)
    n_col = pl.cdiv(F, tc)

    # Put the axis with more steps first so megacore splits a long parallel dim;
    # pe's block index only depends on the column, so it stays resident across the
    # other axis (and is DMA'd exactly once in the common n_col == 1 case).
    if n_col > n_row:
        grid = (n_col, n_row)
        x_spec = pl.BlockSpec((tr, tc), lambda c, r: (r, c))
        pe_spec = pl.BlockSpec((1, tc), lambda c, r: (0, c))
        o_spec = pl.BlockSpec((tr, tc), lambda c, r: (r, c))
    else:
        grid = (n_row, n_col)
        x_spec = pl.BlockSpec((tr, tc), lambda r, c: (r, c))
        pe_spec = pl.BlockSpec((1, tc), lambda r, c: (0, c))
        o_spec = pl.BlockSpec((tr, tc), lambda r, c: (r, c))

    # Honest VMEM accounting from actual tile sizes: sublane dim pads to the packed
    # tile (min_tr), lane dim pads to 128; x/out double-buffered, pe conservatively
    # counted as double-buffered even when its block index never changes.
    tc_pad = _round_up(F, _LANE) if tc == F else tc
    xo_buf = _round_up(max(tr, 1), min_tr) * tc_pad * itemsize
    pe_buf = min_tr * tc_pad * itemsize
    vmem_limit = int(4 * xo_buf + 2 * pe_buf + _VMEM_SLACK_BYTES)

    y2 = pl.pallas_call(
        _add_pe_kernel,
        out_shape=jax.ShapeDtypeStruct((B, F), x.dtype),
        grid=grid,
        in_specs=[x_spec, pe_spec],
        out_specs=o_spec,
        compiler_params=pltpu.CompilerParams(
            dimension_semantics=("parallel", "parallel"),
            vmem_limit_bytes=vmem_limit,
        ),
    )(x2, pe2)
    # NOTE: callers that can donate x may add input_output_aliases={0: 0} to avoid a
    # fresh HBM output allocation; left off so non-donated inputs don't warn.
    return y2.reshape(B, S, D)


if __name__ == "__main__":
    MAX_LEN = 60
    key = jax.random.PRNGKey(0)
    k0, k1, k2 = jax.random.split(key, 3)

    # Toy shape implied by the module: (batch, seq, d_model)
    B, S, D = 2, 8, 32
    x = jax.random.normal(k0, (B, S, D), dtype=jnp.float32)
    pe = make_positional_encoding(d_model=D, max_len=MAX_LEN, dtype=jnp.float32)
    y = jax.block_until_ready(positional_encoding_forward(x, pe))
    y_ref = x + pe[:, :S, :]
    assert y.shape == (B, S, D)
    assert jnp.allclose(y, y_ref, atol=1e-6, rtol=1e-6)

    # bf16 input (exercises packed-sublane row handling and the pe pre-cast).
    B2, S2, D2 = 8, 24, 64
    x2 = jax.random.normal(k1, (B2, S2, D2), dtype=jnp.bfloat16)
    pe2 = make_positional_encoding(d_model=D2, max_len=MAX_LEN, dtype=jnp.float32)
    y2 = jax.block_until_ready(positional_encoding_forward(x2, pe2))
    y2_ref = x2 + pe2[:, :S2, :].astype(jnp.bfloat16)
    assert jnp.allclose(y2.astype(jnp.float32), y2_ref.astype(jnp.float32),
                        atol=1e-2, rtol=1e-2)

    # Larger batch: exercises the multi-step row grid, a partial edge row tile,
    # and the fully resident pe block.
    B3, S3, D3 = 48, 60, 512
    x3 = jax.random.normal(k2, (B3, S3, D3), dtype=jnp.float32)
    pe3 = make_positional_encoding(d_model=D3, max_len=MAX_LEN, dtype=jnp.float32)
    y3 = jax.block_until_ready(positional_encoding_forward(x3, pe3))
    y3_ref = x3 + pe3[:, :S3, :]
    assert jnp.allclose(y3, y3_ref, atol=1e-6, rtol=1e-6)

    # Odd d_model does not crash during pe construction.
    _ = make_positional_encoding(d_model=5, max_len=MAX_LEN)

    print("KERNEL_OK")
</pallas_src>

<mosaic_0001>
module attributes {stable_mosaic.version = 11 : i64} {
  func.func @_add_pe_kernel(%arg0: i32, %arg1: i32, %arg2: memref<2x256xf32, #tpu.memory_space<vmem>>, %arg3: memref<1x256xf32, #tpu.memory_space<vmem>>, %arg4: memref<2x256xf32, #tpu.memory_space<vmem>>) attributes {dimension_semantics = [#tpu.dimension_semantics<parallel>, #tpu.dimension_semantics<parallel>], iteration_bounds = array<i64: 1, 1>, scalar_prefetch = 0 : i64, scratch_operands = 0 : i64, tpu.core_type = #tpu.core_type<tc>, window_params = [{transform_indices = @transform_0, window_bounds = array<i64: 2, 256>}, {transform_indices = @transform_1, window_bounds = array<i64: 1, 256>}, {transform_indices = @transform_2, window_bounds = array<i64: 2, 256>}]} {
    %c0 = arith.constant 0 : index
    %c0_0 = arith.constant 0 : index
    %0 = vector.load %arg2[%c0, %c0_0] : memref<2x256xf32, #tpu.memory_space<vmem>>, vector<2x256xf32>
    %c0_1 = arith.constant 0 : index
    %c0_2 = arith.constant 0 : index
    %1 = vector.load %arg3[%c0_1, %c0_2] : memref<1x256xf32, #tpu.memory_space<vmem>>, vector<1x256xf32>
    %2 = vector.broadcast %1 : vector<1x256xf32> to vector<2x256xf32>
    %3 = arith.addf %0, %2 : vector<2x256xf32>
    %c0_3 = arith.constant 0 : index
    %c0_4 = arith.constant 0 : index
    %4 = vector.load %arg4[%c0_3, %c0_4] : memref<2x256xf32, #tpu.memory_space<vmem>>, vector<2x256xf32>
    tpu.vector_store %arg4[%c0_3, %c0_4], %3 {strides = array<i32>} : memref<2x256xf32, #tpu.memory_space<vmem>>, vector<2x256xf32>,
    return
  }
  func.func @transform_0(%arg0: i32, %arg1: i32) -> (i32, i32) {
    %c0_i32 = arith.constant 0 : i32
    return %arg0, %arg1 : i32, i32
  }
  func.func @transform_1(%arg0: i32, %arg1: i32) -> (i32, i32) {
    %c0_i32 = arith.constant 0 : i32
    %c0_i32_0 = arith.constant 0 : i32
    return %c0_i32, %arg1 : i32, i32
  }
  func.func @transform_2(%arg0: i32, %arg1: i32) -> (i32, i32) {
    %c0_i32 = arith.constant 0 : i32
    return %arg0, %arg1 : i32, i32
  }
}

</mosaic_0001>

<bundles_post_ra>
// kernel: positional_encoding_forward.1
= control target key start
LH: loop header
LB: loop body
LE: loop exit
PB: predicated region body
PF: predicated region fallthrough
CT: control target
= control target key end

     0   :  { %v14_v0 = vlaneseq  ;;  %v38_v1 = vmov 1983009808   ;;  %s63_s1 = inlined_call_operand.vmem [shape: f32[1,256], index: 1, kind: input, shape index: {}]   ;;  %s64_s0 = inlined_call_operand.vmem [shape: f32[2,256], index: 0, kind: input, shape index: {}]   ;;  %s65_s2 = inlined_call_operand.vmem [shape: f32[2,256], index: 2, kind: output, shape index: {}]  }
   0x1   :  { %v24_v2 = vunpack.c.l.s4 %v38_v1  ;;  %v12_v4 = vld [vmem:[%s63_s1] sm:$0x3] }
   0x2   :  { %v15_v3 = vshrl.u32 %v14_v0, 7  ;;  %v11_v12 = vld [vmem:[%s64_s0] sm:$0xf] }
   0x3   :  { %v25_v5 = vunpack.c.0.s8 %v24_v2 }
   0x4   :  { %v16_v6 = vsub.s32 0, %v15_v3  ;;  %v20_v7 = vsub.s32 1, %v15_v3 }
   0x5   :  { %v28_v10 = vsub.s32 %v25_v5, %v15_v3 }
   0x6   :  { %v17_v8 = vrot.slane %v12_v4, %v16_v6  ;;  %v21_v9 = vrot.slane %v12_v4, %v20_v7 }
   0x8   :  { %v22_v11 = vcombine.low %v17_v8, %v21_v9 }
   0xa   :  { %v29_v13 = vrot.slane %v22_v11, %v28_v10 }
   0xc   :  { %v31_v14 = vadd.f32 %v29_v13, %v11_v12 }
   0xe   :  { %32 = vst [vmem:[%s65_s2] sm:$0xf] %v31_v14 }

</bundles_post_ra>
